<compile_context>
chip_gen: v5e
topology: v5e:2x2
jax: 0.10.0
libtpu: 0.0.40
codegen_flags: <defaults>
</compile_context>

<pallas_src>
import functools

import jax
import jax.numpy as jnp
from jax.experimental import pallas as pl
from jax.experimental.pallas import tpu as pltpu

_LANE = 128
_MiB = 1024 * 1024


def _round_up(n, m):
    return ((n + m - 1) // m) * m


def _sublane_multiple(dtype):
    # (8,128) min tile for 32-bit, (16,128) for bf16, (32,128) for 8-bit types.
    return max(8, 32 // jnp.dtype(dtype).itemsize)


def _gelu_f32(x, approximate):
    if approximate:
        # tanh-GELU: transcendental issues in the EUP slot (cheaper when VPU-bound).
        c = jnp.float32(0.7978845608028654)  # sqrt(2/pi)
        return 0.5 * x * (1.0 + jnp.tanh(c * (x + 0.044715 * (x * x * x))))
    # Exact erf-GELU == PyTorch nn.GELU() default.
    return 0.5 * x * (1.0 + jax.lax.erf(x * jnp.float32(0.7071067811865476)))


def _make_kernel(depth, identity_skip, operand_dtype, approximate_gelu):
    operand_dtype = jnp.dtype(operand_dtype)

    def kernel(*refs):
        # refs = (x_ref, w0, b0, ..., w_{d-1}, b_{d-1}, [w_skip], o_ref)
        x_ref = refs[0]
        o_ref = refs[-1]
        wb = refs[1:1 + 2 * depth]

        x = x_ref[...]  # keep MXU operands in their native dtype (bf16 stays bf16)

        # Skip projection first so x goes dead right after layer 0 (smaller live range).
        if identity_skip:
            skip = x.astype(jnp.float32)
        else:
            skip = jnp.dot(x, refs[1 + 2 * depth][...],
                           preferred_element_type=jnp.float32)

        h_dot = x
        h = None
        for i in range(depth):
            z = jnp.dot(h_dot, wb[2 * i][...], preferred_element_type=jnp.float32)
            z = z + wb[2 * i + 1][...].astype(jnp.float32)
            h = _gelu_f32(z, approximate_gelu)      # elementwise stays f32 (v5e-safe)
            if i + 1 < depth:
                h_dot = h.astype(operand_dtype)     # downcast only to feed the MXU

        o_ref[...] = (h + skip).astype(o_ref.dtype)

    return kernel


@functools.partial(jax.jit, static_argnames=("block_b", "approximate_gelu"))
def residual_mlp(x, *params, block_b=1024, approximate_gelu=False):
    """ResidualMLP forward.

    x      : [B, in_dim]
    params : w0, b0, ..., w_{depth-1}, b_{depth-1} [, w_skip]
             w_i : (in_features, out_features)   (torch Linear weight transposed)
             b_i : (out_features,) or (1, out_features)
             w_skip present only when in_dim != hidden_dim (Linear, bias=False).
    Returns [B, hidden_dim] in x.dtype.
    """
    assert len(params) >= 2
    has_skip_w = (len(params) % 2 == 1)
    depth = len(params) // 2
    wbs = params[:2 * depth]
    w_skip = params[-1] if has_skip_w else None

    B, in_dim = x.shape
    hidden = wbs[0].shape[1]

    # Lane-dense padding of feature dims (exact: zero pads contribute nothing).
    in_pad = _round_up(in_dim, _LANE)
    hid_pad = _round_up(hidden, _LANE)

    # Batch tiling: big tiles, sublane-aligned, cdiv-style grid via zero-padded batch.
    sub = _sublane_multiple(x.dtype)
    blk = _round_up(max(1, min(block_b, B)), sub)
    B_pad = _round_up(B, blk)
    grid = (B_pad // blk,)

    x_p = jnp.pad(x, ((0, B_pad - B), (0, in_pad - in_dim)))

    padded = []
    prev, prev_pad = in_dim, in_pad
    for i in range(depth):
        w = wbs[2 * i]
        b = wbs[2 * i + 1].reshape(1, -1)
        padded.append(jnp.pad(w, ((0, prev_pad - prev), (0, hid_pad - hidden))))
        padded.append(jnp.pad(b, ((0, 0), (0, hid_pad - hidden))))
        prev, prev_pad = hidden, hid_pad
    if has_skip_w:
        padded.append(jnp.pad(w_skip, ((0, in_pad - in_dim), (0, hid_pad - hidden))))

    def full_spec(arr):
        nd = arr.ndim
        return pl.BlockSpec(arr.shape, lambda i, _nd=nd: (0,) * _nd)

    in_specs = [pl.BlockSpec((blk, in_pad), lambda i: (i, 0))]
    in_specs += [full_spec(p) for p in padded]   # weights/biases: full block, constant index
    out_spec = pl.BlockSpec((blk, hid_pad), lambda i: (i, 0))

    kernel = _make_kernel(depth, not has_skip_w, x.dtype, approximate_gelu)

    # VMEM budget: double-buffered x/out tiles + (double-buffered) resident weights + f32
    # intermediates, with headroom. Capped at 64 MiB so the same choice is safe on v7x.
    weight_bytes = sum(p.size * p.dtype.itemsize for p in padded)
    io_bytes = 2 * blk * (in_pad + hid_pad) * x.dtype.itemsize
    interm_bytes = 6 * blk * hid_pad * 4
    needed = 2 * weight_bytes + io_bytes + interm_bytes
    vmem_limit = int(min(max(2 * needed, 32 * _MiB), 64 * _MiB))

    out_padded = pl.pallas_call(
        kernel,
        out_shape=jax.ShapeDtypeStruct((B_pad, hid_pad), x.dtype),
        grid_spec=pltpu.PrefetchScalarGridSpec(
            num_scalar_prefetch=0,
            grid=grid,
            in_specs=in_specs,
            out_specs=out_spec,
        ),
        compiler_params=pltpu.CompilerParams(
            dimension_semantics=("parallel",),   # batch axis shards across v7x's 2 TCs
            vmem_limit_bytes=vmem_limit,
        ),
    )(x_p, *padded)

    return out_padded[:B, :hidden]


def init_params(key, in_dim, hidden_dim, depth=3, dtype=jnp.float32):
    """nn.Linear-style init; weights returned pre-transposed as (in, out), biases (1, out).
    No skip weight is returned when in_dim == hidden_dim (module uses nn.Identity)."""
    params = []
    dims = [in_dim] + [hidden_dim] * depth
    keys = jax.random.split(key, depth + 1)
    for i in range(depth):
        bound = 1.0 / float(dims[i]) ** 0.5
        kw, kb = jax.random.split(keys[i])
        w = jax.random.uniform(kw, (dims[i], dims[i + 1]), dtype, -bound, bound)
        b = jax.random.uniform(kb, (1, dims[i + 1]), dtype, -bound, bound)
        params += [w, b]
    if in_dim != hidden_dim:
        bound = 1.0 / float(in_dim) ** 0.5
        params.append(jax.random.uniform(keys[-1], (in_dim, hidden_dim), dtype, -bound, bound))
    return params


def residual_mlp_ref(x, params, approximate_gelu=False):
    has_skip_w = (len(params) % 2 == 1)
    depth = len(params) // 2
    h = x
    for i in range(depth):
        w, b = params[2 * i], params[2 * i + 1]
        h = jax.nn.gelu(h @ w + b.reshape(1, -1), approximate=approximate_gelu)
    return h + (x @ params[-1] if has_skip_w else x)


if __name__ == "__main__":
    key = jax.random.PRNGKey(0)
    k_x, k_p, k_x2, k_p2 = jax.random.split(key, 4)

    # Case 1: in_dim != hidden_dim -> Linear skip (bias=False).
    B, in_dim, hidden_dim, depth = 8, 16, 32, 3
    x = jax.random.normal(k_x, (B, in_dim), jnp.float32)
    params = init_params(k_p, in_dim, hidden_dim, depth)
    out = jax.block_until_ready(residual_mlp(x, *params))
    ref = residual_mlp_ref(x, params)
    assert out.shape == (B, hidden_dim)
    assert jnp.allclose(out, ref, atol=1e-5, rtol=1e-5), float(jnp.abs(out - ref).max())

    # Case 2: in_dim == hidden_dim -> Identity skip (plain add), batch not a multiple of 8.
    B2, D2 = 10, 32
    x2 = jax.random.normal(k_x2, (B2, D2), jnp.float32)
    params2 = init_params(k_p2, D2, D2, depth)
    out2 = jax.block_until_ready(residual_mlp(x2, *params2))
    ref2 = residual_mlp_ref(x2, params2)
    assert out2.shape == (B2, D2)
    assert jnp.allclose(out2, ref2, atol=1e-5, rtol=1e-5), float(jnp.abs(out2 - ref2).max())

    print("KERNEL_OK")
</pallas_src>

<mosaic_0001>
module attributes {stable_mosaic.version = 11 : i64} {
  func.func @kernel(%arg0: i32, %arg1: memref<8x128xf32, #tpu.memory_space<vmem>>, %arg2: memref<128x128xf32, #tpu.memory_space<vmem>>, %arg3: memref<1x128xf32, #tpu.memory_space<vmem>>, %arg4: memref<128x128xf32, #tpu.memory_space<vmem>>, %arg5: memref<1x128xf32, #tpu.memory_space<vmem>>, %arg6: memref<128x128xf32, #tpu.memory_space<vmem>>, %arg7: memref<1x128xf32, #tpu.memory_space<vmem>>, %arg8: memref<128x128xf32, #tpu.memory_space<vmem>>, %arg9: memref<8x128xf32, #tpu.memory_space<vmem>>) attributes {dimension_semantics = [#tpu.dimension_semantics<parallel>], iteration_bounds = array<i64: 1>, scalar_prefetch = 0 : i64, scratch_operands = 0 : i64, tpu.core_type = #tpu.core_type<tc>, window_params = [{transform_indices = @transform_0, window_bounds = array<i64: 8, 128>}, {pipeline_mode = #tpu.pipeline_mode<synchronous>, transform_indices = @transform_1, window_bounds = array<i64: 128, 128>}, {pipeline_mode = #tpu.pipeline_mode<synchronous>, transform_indices = @transform_2, window_bounds = array<i64: 1, 128>}, {pipeline_mode = #tpu.pipeline_mode<synchronous>, transform_indices = @transform_3, window_bounds = array<i64: 128, 128>}, {pipeline_mode = #tpu.pipeline_mode<synchronous>, transform_indices = @transform_4, window_bounds = array<i64: 1, 128>}, {pipeline_mode = #tpu.pipeline_mode<synchronous>, transform_indices = @transform_5, window_bounds = array<i64: 128, 128>}, {pipeline_mode = #tpu.pipeline_mode<synchronous>, transform_indices = @transform_6, window_bounds = array<i64: 1, 128>}, {pipeline_mode = #tpu.pipeline_mode<synchronous>, transform_indices = @transform_7, window_bounds = array<i64: 128, 128>}, {transform_indices = @transform_8, window_bounds = array<i64: 8, 128>}]} {
    %c0 = arith.constant 0 : index
    %c0_0 = arith.constant 0 : index
    %0 = vector.load %arg1[%c0, %c0_0] : memref<8x128xf32, #tpu.memory_space<vmem>>, vector<8x128xf32>
    %c0_1 = arith.constant 0 : index
    %c0_2 = arith.constant 0 : index
    %1 = vector.load %arg8[%c0_1, %c0_2] : memref<128x128xf32, #tpu.memory_space<vmem>>, vector<128x128xf32>
    %cst = arith.constant dense<0.000000e+00> : vector<8x128xf32>
    %2 = tpu.matmul %0, %1, %cst {dimension_numbers = #tpu.dot_dimension_numbers<[1], [0], [0], [1], [0, 0, 1, 1], [], []>} : vector<8x128xf32>, vector<128x128xf32>, vector<8x128xf32> -> vector<8x128xf32>
    %c0_3 = arith.constant 0 : index
    %c0_4 = arith.constant 0 : index
    %3 = vector.load %arg2[%c0_3, %c0_4] : memref<128x128xf32, #tpu.memory_space<vmem>>, vector<128x128xf32>
    %cst_5 = arith.constant dense<0.000000e+00> : vector<8x128xf32>
    %4 = tpu.matmul %0, %3, %cst_5 {dimension_numbers = #tpu.dot_dimension_numbers<[1], [0], [0], [1], [0, 0, 1, 1], [], []>} : vector<8x128xf32>, vector<128x128xf32>, vector<8x128xf32> -> vector<8x128xf32>
    %c0_6 = arith.constant 0 : index
    %c0_7 = arith.constant 0 : index
    %5 = vector.load %arg3[%c0_6, %c0_7] : memref<1x128xf32, #tpu.memory_space<vmem>>, vector<1x128xf32>
    %6 = vector.broadcast %5 : vector<1x128xf32> to vector<8x128xf32>
    %7 = arith.addf %4, %6 : vector<8x128xf32>
    %cst_8 = arith.constant 5.000000e-01 : f32
    %8 = vector.broadcast %cst_8 : f32 to vector<8x128xf32>
    %9 = arith.mulf %8, %7 : vector<8x128xf32>
    %cst_9 = arith.constant 0.707106769 : f32
    %10 = vector.broadcast %cst_9 : f32 to vector<8x128xf32>
    %11 = arith.mulf %7, %10 : vector<8x128xf32>
    %12 = math.erf %11 : vector<8x128xf32>
    %cst_10 = arith.constant 1.000000e+00 : f32
    %13 = vector.broadcast %cst_10 : f32 to vector<8x128xf32>
    %14 = arith.addf %13, %12 : vector<8x128xf32>
    %15 = arith.mulf %9, %14 : vector<8x128xf32>
    %c0_11 = arith.constant 0 : index
    %c0_12 = arith.constant 0 : index
    %16 = vector.load %arg4[%c0_11, %c0_12] : memref<128x128xf32, #tpu.memory_space<vmem>>, vector<128x128xf32>
    %cst_13 = arith.constant dense<0.000000e+00> : vector<8x128xf32>
    %17 = tpu.matmul %15, %16, %cst_13 {dimension_numbers = #tpu.dot_dimension_numbers<[1], [0], [0], [1], [0, 0, 1, 1], [], []>} : vector<8x128xf32>, vector<128x128xf32>, vector<8x128xf32> -> vector<8x128xf32>
    %c0_14 = arith.constant 0 : index
    %c0_15 = arith.constant 0 : index
    %18 = vector.load %arg5[%c0_14, %c0_15] : memref<1x128xf32, #tpu.memory_space<vmem>>, vector<1x128xf32>
    %19 = vector.broadcast %18 : vector<1x128xf32> to vector<8x128xf32>
    %20 = arith.addf %17, %19 : vector<8x128xf32>
    %cst_16 = arith.constant 5.000000e-01 : f32
    %21 = vector.broadcast %cst_16 : f32 to vector<8x128xf32>
    %22 = arith.mulf %21, %20 : vector<8x128xf32>
    %cst_17 = arith.constant 0.707106769 : f32
    %23 = vector.broadcast %cst_17 : f32 to vector<8x128xf32>
    %24 = arith.mulf %20, %23 : vector<8x128xf32>
    %25 = math.erf %24 : vector<8x128xf32>
    %cst_18 = arith.constant 1.000000e+00 : f32
    %26 = vector.broadcast %cst_18 : f32 to vector<8x128xf32>
    %27 = arith.addf %26, %25 : vector<8x128xf32>
    %28 = arith.mulf %22, %27 : vector<8x128xf32>
    %c0_19 = arith.constant 0 : index
    %c0_20 = arith.constant 0 : index
    %29 = vector.load %arg6[%c0_19, %c0_20] : memref<128x128xf32, #tpu.memory_space<vmem>>, vector<128x128xf32>
    %cst_21 = arith.constant dense<0.000000e+00> : vector<8x128xf32>
    %30 = tpu.matmul %28, %29, %cst_21 {dimension_numbers = #tpu.dot_dimension_numbers<[1], [0], [0], [1], [0, 0, 1, 1], [], []>} : vector<8x128xf32>, vector<128x128xf32>, vector<8x128xf32> -> vector<8x128xf32>
    %c0_22 = arith.constant 0 : index
    %c0_23 = arith.constant 0 : index
    %31 = vector.load %arg7[%c0_22, %c0_23] : memref<1x128xf32, #tpu.memory_space<vmem>>, vector<1x128xf32>
    %32 = vector.broadcast %31 : vector<1x128xf32> to vector<8x128xf32>
    %33 = arith.addf %30, %32 : vector<8x128xf32>
    %cst_24 = arith.constant 5.000000e-01 : f32
    %34 = vector.broadcast %cst_24 : f32 to vector<8x128xf32>
    %35 = arith.mulf %34, %33 : vector<8x128xf32>
    %cst_25 = arith.constant 0.707106769 : f32
    %36 = vector.broadcast %cst_25 : f32 to vector<8x128xf32>
    %37 = arith.mulf %33, %36 : vector<8x128xf32>
    %38 = math.erf %37 : vector<8x128xf32>
    %cst_26 = arith.constant 1.000000e+00 : f32
    %39 = vector.broadcast %cst_26 : f32 to vector<8x128xf32>
    %40 = arith.addf %39, %38 : vector<8x128xf32>
    %41 = arith.mulf %35, %40 : vector<8x128xf32>
    %42 = arith.addf %41, %2 : vector<8x128xf32>
    %c0_27 = arith.constant 0 : index
    %c0_28 = arith.constant 0 : index
    %43 = vector.load %arg9[%c0_27, %c0_28] : memref<8x128xf32, #tpu.memory_space<vmem>>, vector<8x128xf32>
    tpu.vector_store %arg9[%c0_27, %c0_28], %42 {strides = array<i32>} : memref<8x128xf32, #tpu.memory_space<vmem>>, vector<8x128xf32>,
    return
  }
  func.func @transform_0(%arg0: i32) -> (i32, i32) {
    %c0_i32 = arith.constant 0 : i32
    %c0_i32_0 = arith.constant 0 : i32
    return %arg0, %c0_i32 : i32, i32
  }
  func.func @transform_1(%arg0: i32) -> (i32, i32) {
    %c0_i32 = arith.constant 0 : i32
    %c0_i32_0 = arith.constant 0 : i32
    %c0_i32_1 = arith.constant 0 : i32
    return %c0_i32, %c0_i32_0 : i32, i32
  }
  func.func @transform_2(%arg0: i32) -> (i32, i32) {
    %c0_i32 = arith.constant 0 : i32
    %c0_i32_0 = arith.constant 0 : i32
    %c0_i32_1 = arith.constant 0 : i32
    return %c0_i32, %c0_i32_0 : i32, i32
  }
  func.func @transform_3(%arg0: i32) -> (i32, i32) {
    %c0_i32 = arith.constant 0 : i32
    %c0_i32_0 = arith.constant 0 : i32
    %c0_i32_1 = arith.constant 0 : i32
    return %c0_i32, %c0_i32_0 : i32, i32
  }
  func.func @transform_4(%arg0: i32) -> (i32, i32) {
    %c0_i32 = arith.constant 0 : i32
    %c0_i32_0 = arith.constant 0 : i32
    %c0_i32_1 = arith.constant 0 : i32
    return %c0_i32, %c0_i32_0 : i32, i32
  }
  func.func @transform_5(%arg0: i32) -> (i32, i32) {
    %c0_i32 = arith.constant 0 : i32
    %c0_i32_0 = arith.constant 0 : i32
    %c0_i32_1 = arith.constant 0 : i32
    return %c0_i32, %c0_i32_0 : i32, i32
  }
  func.func @transform_6(%arg0: i32) -> (i32, i32) {
    %c0_i32 = arith.constant 0 : i32
    %c0_i32_0 = arith.constant 0 : i32
    %c0_i32_1 = arith.constant 0 : i32
    return %c0_i32, %c0_i32_0 : i32, i32
  }
  func.func @transform_7(%arg0: i32) -> (i32, i32) {
    %c0_i32 = arith.constant 0 : i32
    %c0_i32_0 = arith.constant 0 : i32
    %c0_i32_1 = arith.constant 0 : i32
    return %c0_i32, %c0_i32_0 : i32, i32
  }
  func.func @transform_8(%arg0: i32) -> (i32, i32) {
    %c0_i32 = arith.constant 0 : i32
    %c0_i32_0 = arith.constant 0 : i32
    return %arg0, %c0_i32 : i32, i32
  }
}

</mosaic_0001>

<bundles_post_ra>
// kernel: residual_mlp.1
= control target key start
LH: loop header
LB: loop body
LE: loop exit
PB: predicated region body
PF: predicated region fallthrough
CT: control target
= control target key end

     0   :  { %s642_s0 = inlined_call_operand.vmem [shape: f32[8,128], index: 0, kind: input, shape index: {}]   ;;  %s643_s1 = inlined_call_operand.vmem [shape: f32[128,128], index: 1, kind: input, shape index: {}]   ;;  %s644_s2 = inlined_call_operand.vmem [shape: f32[1,128], index: 2, kind: input, shape index: {}]   ;;  %s645_s3 = inlined_call_operand.vmem [shape: f32[128,128], index: 3, kind: input, shape index: {}]   ;;  %s646_s4 = inlined_call_operand.vmem [shape: f32[1,128], index: 4, kind: input, shape index: {}]   ;;  %s647_s5 = inlined_call_operand.vmem [shape: f32[128,128], index: 5, kind: input, shape index: {}]   ;;  %s648_s6 = inlined_call_operand.vmem [shape: f32[1,128], index: 6, kind: input, shape index: {}]   ;;  %s649_s7 = inlined_call_operand.vmem [shape: f32[128,128], index: 7, kind: input, shape index: {}]   ;;  %s650_s8 = inlined_call_operand.hbm [shape: f32[8,128], index: 8, kind: output, shape index: {}]  }
   0x1   :  { %v82_v0 = vld [vmem:[%s643_s1 + $0x78] sm:$0xff]  ;;  %v81_v1 = vld [vmem:[%s643_s1 + $0x70] sm:$0xff]  ;;  %v80_v2 = vld [vmem:[%s643_s1 + $0x68] sm:$0xff] }
   0x2   :  { %87 = vmatpush.msra.mxu1 %v82_v0  ;;  %v79_v3 = vld [vmem:[%s643_s1 + $0x60] sm:$0xff]  ;;  %v78_v4 = vld [vmem:[%s643_s1 + $0x58] sm:$0xff] }
   0x4   :  { %88 = vmatpush.msra.mxu1 %v81_v1 }
   0x6   :  { %89 = vmatpush.msra.mxu1 %v80_v2 }
   0x8   :  { %90 = vmatpush.msra.mxu1 %v79_v3 }
   0x9   :  { %13 = vsyncpa [#allocation3], 0  ;;  %v77_v5 = vld [vmem:[%s643_s1 + $0x50] sm:$0xff]  ;;  %v76_v6 = vld [vmem:[%s643_s1 + $0x48] sm:$0xff]  ;;  %s328_s14 = sshll.u32 %s650_s8, 4  ;;  %s329_s14 = int_to_ptr.hbm [resolvable:$true] %s328_s14 }
   0xa   :  { %91 = vmatpush.msra.mxu1 %v78_v4  ;;  %v75_v7 = vld [vmem:[%s643_s1 + $0x40] sm:$0xff]  ;;  %v74_v8 = vld [vmem:[%s643_s1 + $0x38] sm:$0xff]  ;;  %v73_v9 = vld [vmem:[%s643_s1 + $0x30] sm:$0xff] }
   0xb   :  { %v72_v10 = vld [vmem:[%s643_s1 + $0x28] sm:$0xff]  ;;  %v71_v11 = vld [vmem:[%s643_s1 + $0x20] sm:$0xff]  ;;  %v70_v12 = vld [vmem:[%s643_s1 + $0x18] sm:$0xff] }
   0xc   :  { %92 = vmatpush.msra.mxu1 %v77_v5  ;;  %v69_v13 = vld [vmem:[%s643_s1 + $0x10] sm:$0xff]  ;;  %v68_v14 = vld [vmem:[%s643_s1 + $0x8] sm:$0xff]  ;;  %v67_v15 = vld [vmem:[%s643_s1] sm:$0xff] }
   0xd   :  { %v473_v16 = vld [vmem:[%s642_s0] sm:$0xff]  ;;  %v166_v17 = vld [vmem:[%s645_s3 + $0x78] sm:$0xff]  ;;  %v165_v18 = vld [vmem:[%s645_s3 + $0x70] sm:$0xff] }
   0xe   :  { %93 = vmatpush.msra.mxu1 %v76_v6  ;;  %171 = vmatpush.msra.mxu2 %v166_v17  ;;  %v164_v19 = vld [vmem:[%s645_s3 + $0x68] sm:$0xff]  ;;  %v163_v20 = vld [vmem:[%s645_s3 + $0x60] sm:$0xff]  ;;  %v162_v22 = vld [vmem:[%s645_s3 + $0x58] sm:$0xff] }
   0xf   :  { %v341_v21 = vld [vmem:[%s644_s2] ss:$0 sm:$0xff]  ;;  %v161_v23 = vld [vmem:[%s645_s3 + $0x50] sm:$0xff]  ;;  %v160_v25 = vld [vmem:[%s645_s3 + $0x48] sm:$0xff] }
  0x10   :  { %94 = vmatpush.msra.mxu1 %v75_v7  ;;  %172 = vmatpush.msra.mxu2 %v165_v18  ;;  %v159_v27 = vld [vmem:[%s645_s3 + $0x40] sm:$0xff]  ;;  %v158_v29 = vld [vmem:[%s645_s3 + $0x38] sm:$0xff]  ;;  %v157_v31 = vld [vmem:[%s645_s3 + $0x30] sm:$0xff] }
  0x11   :  { %v156_v33 = vld [vmem:[%s645_s3 + $0x28] sm:$0xff]  ;;  %v155_v36 = vld [vmem:[%s645_s3 + $0x20] sm:$0xff]  ;;  %v154_v39 = vld [vmem:[%s645_s3 + $0x18] sm:$0xff] }
  0x12   :  { %95 = vmatpush.msra.mxu1 %v74_v8  ;;  %173 = vmatpush.msra.mxu2 %v164_v19  ;;  %v153_v42 = vld [vmem:[%s645_s3 + $0x10] sm:$0xff]  ;;  %v152_v45 = vld [vmem:[%s645_s3 + $0x8] sm:$0xff]  ;;  %v151_v47 = vld [vmem:[%s645_s3] sm:$0xff] }
  0x13   :  { %v246_v17 = vld [vmem:[%s647_s5 + $0x58] sm:$0xff]  ;;  %v245_v18 = vld [vmem:[%s647_s5 + $0x50] sm:$0xff] }
  0x14   :  { %96 = vmatpush.msra.mxu1 %v73_v9  ;;  %174 = vmatpush.msra.mxu2 %v163_v20 }
  0x16   :  { %97 = vmatpush.msra.mxu1 %v72_v10  ;;  %175 = vmatpush.msra.mxu2 %v162_v22 }
  0x18   :  { %98 = vmatpush.msra.mxu1 %v71_v11  ;;  %176 = vmatpush.msra.mxu2 %v161_v23  ;;  %v250_v11 = vld [vmem:[%s647_s5 + $0x78] sm:$0xff]  ;;  %v243_v23 = vld [vmem:[%s647_s5 + $0x40] sm:$0xff] }
  0x19   :  { %255 = vmatpush.msra.mxu3 %v250_v11 }
  0x1a   :  { %99 = vmatpush.msra.mxu1 %v70_v12  ;;  %177 = vmatpush.msra.mxu2 %v160_v25  ;;  %v249_v12 = vld [vmem:[%s647_s5 + $0x70] sm:$0xff]  ;;  %v242_v25 = vld [vmem:[%s647_s5 + $0x38] sm:$0xff] }
  0x1b   :  { %256 = vmatpush.msra.mxu3 %v249_v12  ;;  %v34_v12 = vld [vmem:[%s649_s7 + $0x18] sm:$0xff] }
  0x1c   :  { %100 = vmatpush.msra.mxu1 %v69_v13  ;;  %178 = vmatpush.msra.mxu2 %v159_v27  ;;  %v248_v13 = vld [vmem:[%s647_s5 + $0x68] sm:$0xff]  ;;  %v241_v27 = vld [vmem:[%s647_s5 + $0x30] sm:$0xff] }
  0x1d   :  { %257 = vmatpush.msra.mxu3 %v248_v13 }
  0x1e   :  { %101 = vmatpush.msra.mxu1 %v68_v14  ;;  %179 = vmatpush.msra.mxu2 %v158_v29  ;;  %v342_v14 = vld [vmem:[%s646_s4] ss:$0 sm:$0xff]  ;;  %v240_v29 = vld [vmem:[%s647_s5 + $0x28] sm:$0xff] }
  0x20   :  { %102 = vmatpush.msra.mxu1 %v67_v15  ;;  %180 = vmatpush.msra.mxu2 %v157_v31  ;;  %v247_v15 = vld [vmem:[%s647_s5 + $0x60] sm:$0xff] }
  0x21   :  { %103 = vmatmul.f32.vlgmr.msra.gmra.mxu1 %v473_v16  ;;  %258 = vmatpush.msra.mxu3 %v247_v15  ;;  %v33_v15 = vld [vmem:[%s649_s7 + $0x10] sm:$0xff] }
  0x22   :  { %181 = vmatpush.msra.mxu2 %v156_v33 }
  0x23   :  { %259 = vmatpush.msra.mxu3 %v246_v17 }
  0x24   :  { %182 = vmatpush.msra.mxu2 %v155_v36 }
  0x25   :  { %260 = vmatpush.msra.mxu3 %v245_v18  ;;  %v32_v18 = vld [vmem:[%s649_s7 + $0x8] sm:$0xff] }
  0x26   :  { %183 = vmatpush.msra.mxu2 %v154_v39 }
  0x28   :  { %184 = vmatpush.msra.mxu2 %v153_v42  ;;  %v235_v42 = vld [vmem:[%s647_s5] sm:$0xff] }
  0x2a   :  { %185 = vmatpush.msra.mxu2 %v152_v45 }
  0x2c   :  { %186 = vmatpush.msra.mxu2 %v151_v47  ;;  %v45_v47 = vld [vmem:[%s649_s7 + $0x70] sm:$0xff] }
  0x9e   :  { %v104_v24 = vpop.f32.mrf.mxu1 }
  0x9f   :  { %v105_v26 = vadd.f32 %v341_v21, %v104_v24  ;;  %v244_v21 = vld [vmem:[%s647_s5 + $0x48] sm:$0xff] }
  0xa0   :  { %261 = vmatpush.msra.mxu3 %v244_v21 }
  0xa1   :  { %v108_v28 = vmul.f32 0.70710677, %v105_v26  ;;  %v107_v8 = vmul.f32 0.5, %v105_v26 }
  0xa2   :  { %262 = vmatpush.msra.mxu3 %v243_v23 }
  0xa3   :  { %v109_v30 = vmul.f32 %v108_v28, %v108_v28 }
  0xa4   :  { %263 = vmatpush.msra.mxu3 %v242_v25 }
  0xa5   :  { %v110_v32 = vmin.f32 %v109_v30, 16.0 }
  0xa6   :  { %264 = vmatpush.msra.mxu3 %v241_v27 }
  0xa7   :  { %v111_v34 = vmul.f32 2.1237322e-06, %v110_v32  ;;  %v122_v35 = vmul.f32 3.8918573e-05, %v110_v32 }
  0xa8   :  { %265 = vmatpush.msra.mxu3 %v240_v29 }
  0xa9   :  { %v112_v37 = vadd.f32 0.00028619796, %v111_v34  ;;  %v123_v38 = vadd.f32 0.001143296, %v122_v35  ;;  %v238_v35 = vld [vmem:[%s647_s5 + $0x18] sm:$0xff] }
  0xab   :  { %v113_v40 = vmul.f32 %v112_v37, %v110_v32  ;;  %v124_v41 = vmul.f32 %v123_v38, %v110_v32  ;;  %v237_v37 = vld [vmem:[%s647_s5 + $0x10] sm:$0xff] }
  0xad   :  { %v125_v43 = vadd.f32 0.014752088, %v124_v41  ;;  %v114_v44 = vadd.f32 0.0036580483, %v113_v40  ;;  %v236_v40 = vld [vmem:[%s647_s5 + $0x8] sm:$0xff] }
  0xaf   :  { %v126_v46 = vmul.f32 %v125_v43, %v110_v32  ;;  %v115_v49 = vmul.f32 %v114_v44, %v110_v32 }
  0xb1   :  { %v127_v48 = vadd.f32 0.112945676, %v126_v46  ;;  %v116_v52 = vadd.f32 0.05243302, %v115_v49  ;;  %v46_v46 = vld [vmem:[%s649_s7 + $0x78] sm:$0xff] }
  0xb2   :  { %47 = vmatpush.msra.mxu0 %v46_v46 }
  0xb3   :  { %v128_v50 = vmul.f32 %v127_v48, %v110_v32  ;;  %v117_v55 = vmul.f32 %v116_v52, %v110_v32  ;;  %v43_v52 = vld [vmem:[%s649_s7 + $0x60] sm:$0xff] }
  0xb4   :  { %48 = vmatpush.msra.mxu0 %v45_v47 }
  0xb5   :  { %v129_v51 = vadd.f32 0.4994258, %v128_v50  ;;  %v118_v56 = vadd.f32 0.18741608, %v117_v55  ;;  %v44_v50 = vld [vmem:[%s649_s7 + $0x68] sm:$0xff]  ;;  %v42_v55 = vld [vmem:[%s649_s7 + $0x58] sm:$0xff] }
  0xb6   :  { %49 = vmatpush.msra.mxu0 %v44_v50 }
  0xb7   :  { %v130_v53 = vmul.f32 %v129_v51, %v110_v32  ;;  %v119_v58 = vmul.f32 %v118_v56, %v110_v32  ;;  %v239_v32 = vld [vmem:[%s647_s5 + $0x20] sm:$0xff]  ;;  %v41_v56 = vld [vmem:[%s649_s7 + $0x50] sm:$0xff] }
  0xb8   :  { %266 = vmatpush.msra.mxu3 %v239_v32  ;;  %50 = vmatpush.msra.mxu0 %v43_v52 }
  0xb9   :  { %v131_v54 = vadd.f32 1.0, %v130_v53  ;;  %v120_v62 = vadd.f32 1.1283791, %v119_v58  ;;  %v40_v58 = vld [vmem:[%s649_s7 + $0x48] sm:$0xff] }
  0xba   :  { %267 = vmatpush.msra.mxu3 %v238_v35  ;;  %51 = vmatpush.msra.mxu0 %v42_v55 }
  0xbb   :  { %344 = vrcp.f32 %v131_v54  ;;  %v143_v61 = vand.u32 2147483648, %v131_v54  ;;  %v141_v0 = vand.u32 2147483647, %v131_v54  ;;  %vm137_vm1 = vweird.f32 %v131_v54 }
  0xbc   :  { %v121_v3 = vmul.f32 %v120_v62, %v108_v28  ;;  %268 = vmatpush.msra.mxu3 %v237_v37  ;;  %52 = vmatpush.msra.mxu0 %v41_v56 }
  0xbd   :  { %v144_v2 = vor.u32 1.1754944e-38, %v143_v61  ;;  %vm142_vm3 = vcmp.eq.f32.partialorder %v141_v0, 8.507059e+37 }
  0xbe   :  { %269 = vmatpush.msra.mxu3 %v236_v40  ;;  %53 = vmatpush.msra.mxu0 %v40_v58 }
  0xc0   :  { %270 = vmatpush.msra.mxu3 %v235_v42 }
  0xc1   :  { %v345_v57 = vpop.eup %344 }
  0xc2   :  { %v133_v59 = vmul.f32 %v345_v57, %v131_v54  ;;  %vm138_vm0 = vweird.f32 %v345_v57 }
  0xc3   :  { %vm139_vm2 = vmor %vm137_vm1, %vm138_vm0 }
  0xc4   :  { %v134_v60 = vsub.f32 1.0, %v133_v59  ;;  %v39_v59 = vld [vmem:[%s649_s7 + $0x40] sm:$0xff] }
  0xc5   :  { %54 = vmatpush.msra.mxu0 %v39_v59 }
  0xc6   :  { %v135_v63 = vmul.f32 %v345_v57, %v134_v60 }
  0xc8   :  { %v136_v1 = vadd.f32 %v345_v57, %v135_v63  ;;  %v38_v63 = vld [vmem:[%s649_s7 + $0x38] sm:$0xff] }
  0xc9   :  { %55 = vmatpush.msra.mxu0 %v38_v63 }
  0xca   :  { %v140_v4 = vsel %vm139_vm2, %v345_v57, %v136_v1  ;;  %v37_v1 = vld [vmem:[%s649_s7 + $0x30] sm:$0xff] }
  0xcb   :  { %v145_v5 = vsel %vm142_vm3, %v144_v2, %v140_v4  ;;  %56 = vmatpush.msra.mxu0 %v37_v1 }
  0xcc   :  { %v146_v6 = vmul.f32 %v145_v5, %v121_v3 }
  0xce   :  { %v337_v7 = vclamps-f32 %v146_v6, 1.0  ;;  %v36_v6 = vld [vmem:[%s649_s7 + $0x28] sm:$0xff] }
  0xcf   :  { %57 = vmatpush.msra.mxu0 %v36_v6 }
  0xd0   :  { %v149_v9 = vadd.f32 1.0, %v337_v7 }
  0xd2   :  { %v150_v10 = vmul.f32 %v149_v9, %v107_v8  ;;  %v35_v8 = vld [vmem:[%s649_s7 + $0x20] sm:$0xff] }
  0xd3   :  { %58 = vmatpush.msra.mxu0 %v35_v8 }
  0xd4   :  { %187 = vmatmul.f32.vlgmr.msra.gmra.mxu2 %v150_v10 }
  0xd5   :  { %59 = vmatpush.msra.mxu0 %v34_v12 }
  0xd7   :  { %60 = vmatpush.msra.mxu0 %v33_v15 }
  0xd9   :  { %61 = vmatpush.msra.mxu0 %v32_v18 }
 0x157   :  { %v188_v19 = vpop.f32.mrf.mxu2 }
 0x158   :  { %v548_v20 = vadd.f32 %v342_v14, %v188_v19 }
 0x15a   :  { %v554_v22 = vmul.f32 0.70710677, %v548_v20  ;;  %v191_v19 = vmul.f32 0.5, %v548_v20 }
 0x15c   :  { %v193_v24 = vmul.f32 %v554_v22, %v554_v22 }
 0x15e   :  { %v194_v26 = vmin.f32 %v193_v24, 16.0  ;;  %v343_v24 = vld [vmem:[%s648_s6] ss:$0 sm:$0xff]  ;;  %s376_s6 = smov [#allocation2]  }
 0x160   :  { %v195_v28 = vmul.f32 2.1237322e-06, %v194_v26  ;;  %v206_v30 = vmul.f32 3.8918573e-05, %v194_v26 }
 0x162   :  { %v196_v31 = vadd.f32 0.00028619796, %v195_v28  ;;  %v207_v33 = vadd.f32 0.001143296, %v206_v30 }
 0x164   :  { %v197_v34 = vmul.f32 %v196_v31, %v194_v26  ;;  %v208_v36 = vmul.f32 %v207_v33, %v194_v26 }
 0x166   :  { %v209_v38 = vadd.f32 0.014752088, %v208_v36  ;;  %v198_v39 = vadd.f32 0.0036580483, %v197_v34 }
 0x168   :  { %v210_v41 = vmul.f32 %v209_v38, %v194_v26  ;;  %v199_v44 = vmul.f32 %v198_v39, %v194_v26 }
 0x16a   :  { %v211_v43 = vadd.f32 0.112945676, %v210_v41  ;;  %v200_v49 = vadd.f32 0.05243302, %v199_v44 }
 0x16c   :  { %v212_v45 = vmul.f32 %v211_v43, %v194_v26  ;;  %v201_v54 = vmul.f32 %v200_v49, %v194_v26 }
 0x16e   :  { %v213_v48 = vadd.f32 0.4994258, %v212_v45  ;;  %v202_v57 = vadd.f32 0.18741608, %v201_v54 }
 0x170   :  { %v214_v51 = vmul.f32 %v213_v48, %v194_v26  ;;  %v203_v61 = vmul.f32 %v202_v57, %v194_v26 }
 0x172   :  { %v215_v53 = vadd.f32 1.0, %v214_v51  ;;  %v204_v3 = vadd.f32 1.1283791, %v203_v61 }
 0x174   :  { %346 = vrcp.f32 %v215_v53  ;;  %v227_v2 = vand.u32 2147483648, %v215_v53  ;;  %v225_v5 = vand.u32 2147483647, %v215_v53  ;;  %vm221_vm5 = vweird.f32 %v215_v53 }
 0x175   :  { %v205_v10 = vmul.f32 %v204_v3, %v554_v22  ;;  %v31_v22 = vld [vmem:[%s649_s7] sm:$0xff]  ;;  %s326_s7 = sshll.u32 %s376_s6, 4  ;;  %s327_s7 = int_to_ptr.vmem [resolvable:$true] %s326_s7 }
 0x176   :  { %v228_v9 = vor.u32 1.1754944e-38, %v227_v2  ;;  %vm226_vm7 = vcmp.eq.f32.partialorder %v225_v5, 8.507059e+37  ;;  %62 = vmatpush.msra.mxu0 %v31_v22 }
 0x177   :  { %63 = vmatmul.f32.vlgmr.msra.gmra.mxu0 %v473_v16 }
 0x17a   :  { %v347_v60 = vpop.eup %346 }
 0x17b   :  { %v217_v62 = vmul.f32 %v347_v60, %v215_v53  ;;  %vm222_vm4 = vweird.f32 %v347_v60 }
 0x17c   :  { %vm223_vm6 = vmor %vm221_vm5, %vm222_vm4 }
 0x17d   :  { %v218_v0 = vsub.f32 1.0, %v217_v62 }
 0x17f   :  { %v219_v4 = vmul.f32 %v347_v60, %v218_v0 }
 0x181   :  { %v220_v7 = vadd.f32 %v347_v60, %v219_v4 }
 0x183   :  { %v224_v11 = vsel %vm223_vm6, %v347_v60, %v220_v7 }
 0x184   :  { %v229_v13 = vsel %vm226_vm7, %v228_v9, %v224_v11 }
 0x185   :  { %v230_v14 = vmul.f32 %v229_v13, %v205_v10 }
 0x187   :  { %v338_v17 = vclamps-f32 %v230_v14, 1.0 }
 0x189   :  { %v233_v21 = vadd.f32 1.0, %v338_v17 }
 0x18b   :  { %v234_v23 = vmul.f32 %v233_v21, %v191_v19 }
 0x18d   :  { %271 = vmatmul.f32.vlgmr.msra.gmra.mxu3 %v234_v23 }
 0x1f4   :  { %v64_v63 = vpop.f32.mrf.mxu0 }
 0x210   :  { %v272_v25 = vpop.f32.mrf.mxu3 }
 0x211   :  { %v273_v26 = vadd.f32 %v343_v24, %v272_v25 }
 0x213   :  { %v276_v27 = vmul.f32 0.70710677, %v273_v26  ;;  %v275_v61 = vmul.f32 0.5, %v273_v26 }
 0x215   :  { %v277_v28 = vmul.f32 %v276_v27, %v276_v27 }
 0x217   :  { %v278_v20 = vmin.f32 %v277_v28, 16.0 }
 0x219   :  { %v279_v29 = vmul.f32 2.1237322e-06, %v278_v20  ;;  %v290_v30 = vmul.f32 3.8918573e-05, %v278_v20 }
 0x21b   :  { %v280_v31 = vadd.f32 0.00028619796, %v279_v29  ;;  %v291_v32 = vadd.f32 0.001143296, %v290_v30 }
 0x21d   :  { %v281_v33 = vmul.f32 %v280_v31, %v278_v20  ;;  %v292_v34 = vmul.f32 %v291_v32, %v278_v20 }
 0x21f   :  { %v293_v35 = vadd.f32 0.014752088, %v292_v34  ;;  %v282_v36 = vadd.f32 0.0036580483, %v281_v33 }
 0x221   :  { %v294_v37 = vmul.f32 %v293_v35, %v278_v20  ;;  %v283_v16 = vmul.f32 %v282_v36, %v278_v20 }
 0x223   :  { %v295_v38 = vadd.f32 0.112945676, %v294_v37  ;;  %v284_v41 = vadd.f32 0.05243302, %v283_v16 }
 0x225   :  { %v296_v39 = vmul.f32 %v295_v38, %v278_v20  ;;  %v285_v44 = vmul.f32 %v284_v41, %v278_v20 }
 0x227   :  { %v297_v40 = vadd.f32 0.4994258, %v296_v39  ;;  %v286_v45 = vadd.f32 0.18741608, %v285_v44 }
 0x229   :  { %v298_v42 = vmul.f32 %v297_v40, %v278_v20  ;;  %v287_v47 = vmul.f32 %v286_v45, %v278_v20 }
 0x22b   :  { %v299_v43 = vadd.f32 1.0, %v298_v42  ;;  %v288_v51 = vadd.f32 1.1283791, %v287_v47 }
 0x22d   :  { %348 = vrcp.f32 %v299_v43  ;;  %v311_v50 = vand.u32 2147483648, %v299_v43  ;;  %v309_v53 = vand.u32 2147483647, %v299_v43  ;;  %vm305_vm9 = vweird.f32 %v299_v43 }
 0x22e   :  { %v289_v56 = vmul.f32 %v288_v51, %v276_v27 }
 0x22f   :  { %v312_v55 = vor.u32 1.1754944e-38, %v311_v50  ;;  %vm310_vm11 = vcmp.eq.f32.partialorder %v309_v53, 8.507059e+37 }
 0x233   :  { %v349_v46 = vpop.eup %348 }
 0x234   :  { %v301_v48 = vmul.f32 %v349_v46, %v299_v43  ;;  %vm306_vm8 = vweird.f32 %v349_v46 }
 0x235   :  { %vm307_vm10 = vmor %vm305_vm9, %vm306_vm8 }
 0x236   :  { %v302_v49 = vsub.f32 1.0, %v301_v48 }
 0x238   :  { %v303_v52 = vmul.f32 %v349_v46, %v302_v49 }
 0x23a   :  { %v304_v54 = vadd.f32 %v349_v46, %v303_v52 }
 0x23c   :  { %v308_v57 = vsel %vm307_vm10, %v349_v46, %v304_v54 }
 0x23d   :  { %v313_v58 = vsel %vm310_vm11, %v312_v55, %v308_v57 }
 0x23e   :  { %v314_v59 = vmul.f32 %v313_v58, %v289_v56 }
 0x240   :  { %v339_v60 = vclamps-f32 %v314_v59, 1.0 }
 0x242   :  { %v317_v62 = vadd.f32 1.0, %v339_v60 }
 0x244   :  { %v318_v0 = vmul.f32 %v317_v62, %v275_v61 }
 0x246   :  { %v319_v1 = vadd.f32 %v318_v0, %v64_v63 }
 0x248   :  { %320 = vst [vmem:[#allocation2] sm:$0xff] %v319_v1 }
 0x249   :  { %331 = dma.vmem_to_hbm [thread:$0]  %s327_s7, 128, %s329_s14, [#allocation3]  }
 0x24a   :  { %374 = dma.done.wait [#allocation3], 128  }
 0x24b   :  { %375 = vsyncadd [#allocation3], 4294967168 }
 0x24c   :  { %336 = vsyncpa [#allocation3], 1 }

</bundles_post_ra>
